<compile_context>
chip_gen: v7x
topology: tpu7x:2x2x1
jax: 0.10.0
libtpu: 0.0.40
codegen_flags: <defaults>
</compile_context>

<pallas_src>
import jax
import jax.numpy as jnp
from jax import lax
from jax.experimental import pallas as pl
from jax.experimental.pallas import tpu as pltpu


def encoder_kernel(p_ref, w1_ref, b1_ref, poolT_ref, w2t_ref, b2_ref, out_ref):
    """One block of B images per grid step.

    p_ref    : (9*Cin, B*H*W)  im2col patch slab (bf16), contraction on sublanes
    w1_ref   : (Cout, 9*Cin)   flattened conv weights (bf16)
    b1_ref   : (Cout, 1)       conv bias (f32)
    poolT_ref: (B, B*H*W)      block-diagonal ones sum-pool matrix (f32)
    w2t_ref  : (Cout, E)       linear weight transposed * 1/(H*W) (f32)
    b2_ref   : (1, E)          linear bias (f32)
    out_ref  : (1, B, E)       embeddings for this block (f32), lane-dense
    """
    _, B, E = out_ref.shape

    # Conv as a single im2col matmul; lane-dense f32 accumulator (Cout, B*H*W).
    acc = jnp.dot(w1_ref[...], p_ref[...],
                  preferred_element_type=jnp.float32)            # (Cout, B*HW)

    # Conv bias + ReLU in f32 (v5e VPU has no bf16 support).
    acc = jnp.maximum(acc + b1_ref[...], 0.0)

    # Per-image global sum-pool as one MXU matmul (A @ B.T form, no transposes
    # or lane-splitting reshapes): (B, B*HW) x (Cout, B*HW)^T -> (B, Cout).
    pooled = lax.dot_general(
        poolT_ref[...], acc,
        dimension_numbers=(((1,), (1,)), ((), ())),
        preferred_element_type=jnp.float32)                      # (B, Cout)

    # Final linear, canonical matmul -> lane-dense (B, E) row block.
    emb = jnp.dot(pooled, w2t_ref[...],
                  preferred_element_type=jnp.float32) + b2_ref[...]   # (B, E)
    out_ref[...] = emb.reshape(1, B, E).astype(out_ref.dtype)


def encoder_forward(x_nchw, w_conv, b_conv, w_lin, b_lin,
                    conv_dtype=jnp.bfloat16, max_images_per_step=8):
    """x_nchw: (N, Cin, H, W) f32 (PyTorch NCHW); w_conv: (Cout, Cin, 3, 3) OIHW;
    b_conv: (Cout,); w_lin: (E, Cout); b_lin: (E,).  Returns (N, E) embedding,
    matching Linear(Flatten(AvgPool(ReLU(Conv2d(x))))).
    """
    N, Cin, H, W = x_nchw.shape
    Cout = w_conv.shape[0]
    E = w_lin.shape[0]
    HW = H * W
    K = 9 * Cin

    # Batch blocking: at least 2 grid steps when N >= 2 (v7x has 2 TensorCores),
    # capped block size purely for overhead/VMEM balance (sweepable).
    if N <= 1:
        B = 1
    else:
        B = min(max_images_per_step, pl.cdiv(N, 2))
    G = pl.cdiv(N, B)
    N_pad = G * B

    # Layout prep (small fused XLA op): NCHW -> NHWC, pad=1 halo.
    x_pad = jnp.pad(jnp.transpose(x_nchw, (0, 2, 3, 1)),
                    ((0, 0), (1, 1), (1, 1), (0, 0)))            # (N, H+2, W+2, Cin)

    # im2col patch slab: column order (kh, kw, cin) matches the weight flattening;
    # final layout (K, N_pad*HW): contraction on sublanes, batch*spatial on lanes.
    taps = [x_pad[:, kh:kh + H, kw:kw + W, :] for kh in range(3) for kw in range(3)]
    patches = jnp.stack(taps, axis=3).reshape(N, HW, K)          # (N, HW, K)
    if N_pad != N:
        patches = jnp.pad(patches, ((0, N_pad - N), (0, 0), (0, 0)))
    patches = jnp.transpose(patches, (2, 0, 1)).reshape(K, N_pad * HW)
    patches = patches.astype(conv_dtype)

    # Conv weights flattened to one contiguous (Cout, 9*Cin) slab, (kh, kw, cin) order.
    w1 = jnp.transpose(w_conv, (0, 2, 3, 1)).reshape(Cout, K).astype(conv_dtype)
    b1 = b_conv.reshape(Cout, 1).astype(jnp.float32)

    # Block-diagonal ones sum-pool matrix: poolT[b, s] = 1 iff local position s
    # belongs to local image b. Kept in f32 so pooling stays high precision.
    poolT = (jnp.arange(B, dtype=jnp.int32)[:, None]
             == (jnp.arange(B * HW, dtype=jnp.int32)[None, :] // HW)
             ).astype(jnp.float32)                               # (B, B*HW)

    # Fold the 1/(H*W) average-pool scale into the (transposed) linear weight.
    w2t = (w_lin.T / float(HW)).astype(jnp.float32)              # (Cout, E)
    b2 = b_lin.reshape(1, E).astype(jnp.float32)

    # Deeper input pipelining only pays off when there are enough grid steps.
    if G >= 3:
        patch_spec = pl.BlockSpec((K, B * HW), lambda g: (0, g),
                                  pipeline_mode=pl.Buffered(3))
    else:
        patch_spec = pl.BlockSpec((K, B * HW), lambda g: (0, g))

    out = pl.pallas_call(
        encoder_kernel,
        out_shape=jax.ShapeDtypeStruct((G, B, E), jnp.float32),
        grid=(G,),
        in_specs=[
            patch_spec,                                           # patches
            pl.BlockSpec((Cout, K), lambda g: (0, 0)),            # w1
            pl.BlockSpec((Cout, 1), lambda g: (0, 0)),            # b1
            pl.BlockSpec((B * HW, B), lambda g: (0, 0))
            if False else pl.BlockSpec((B, B * HW), lambda g: (0, 0)),  # poolT
            pl.BlockSpec((Cout, E), lambda g: (0, 0)),            # w2t
            pl.BlockSpec((1, E), lambda g: (0, 0)),               # b2
        ],
        out_specs=pl.BlockSpec((1, B, E), lambda g: (g, 0, 0)),
        compiler_params=pltpu.CompilerParams(
            dimension_semantics=("parallel",),   # shard batch blocks across v7x TCs
            vmem_limit_bytes=32 << 20),          # safety cap only; not binding here
    )(patches, w1, b1, poolT, w2t, b2)
    return out.reshape(N_pad, E)[:N]


if __name__ == "__main__":
    key = jax.random.PRNGKey(0)
    k_x, k_w1, k_b1, k_w2, k_b2 = jax.random.split(key, 5)

    N, Cin, H, W = 2, 4, 16, 16
    Cout, E = 32, 32

    x = jax.random.normal(k_x, (N, Cin, H, W), jnp.float32)
    w_conv = jax.random.normal(k_w1, (Cout, Cin, 3, 3), jnp.float32) * 0.1
    b_conv = jax.random.normal(k_b1, (Cout,), jnp.float32) * 0.1
    w_lin = jax.random.normal(k_w2, (E, Cout), jnp.float32) * 0.1
    b_lin = jax.random.normal(k_b2, (E,), jnp.float32) * 0.1

    out = encoder_forward(x, w_conv, b_conv, w_lin, b_lin)
    jax.block_until_ready(out)

    # Pure-JAX reference (same semantics as the PyTorch model). The kernel
    # quantizes x / conv weights to bf16 with f32 accumulation, so the reference
    # sees the same bf16-rounded values; remaining differences are f32 summation
    # order and MXU pass precision on the (tiny) f32 pool/linear matmuls.
    xq = x.astype(jnp.bfloat16).astype(jnp.float32)
    wq = w_conv.astype(jnp.bfloat16).astype(jnp.float32)
    y_ref = lax.conv_general_dilated(
        xq, wq, window_strides=(1, 1), padding=((1, 1), (1, 1)),
        dimension_numbers=("NCHW", "OIHW", "NCHW"))
    y_ref = jnp.maximum(y_ref + b_conv[None, :, None, None], 0.0)
    y_ref = jnp.mean(y_ref, axis=(2, 3))                 # global avg pool
    y_ref = y_ref @ w_lin.T + b_lin                      # linear
    assert jnp.allclose(out, y_ref, atol=2e-4, rtol=2e-4), "mismatch vs reference"

    print("KERNEL_OK")
</pallas_src>

<mosaic_0001>
module attributes {stable_mosaic.version = 11 : i64} {
  func.func @encoder_kernel(%arg0: i32, %arg1: memref<36x256xbf16, #tpu.memory_space<vmem>>, %arg2: memref<32x36xbf16, #tpu.memory_space<vmem>>, %arg3: memref<32x1xf32, #tpu.memory_space<vmem>>, %arg4: memref<1x256xf32, #tpu.memory_space<vmem>>, %arg5: memref<32x32xf32, #tpu.memory_space<vmem>>, %arg6: memref<1x32xf32, #tpu.memory_space<vmem>>, %arg7: memref<1x1x32xf32, #tpu.memory_space<vmem>>) attributes {dimension_semantics = [#tpu.dimension_semantics<parallel>], iteration_bounds = array<i64: 2>, scalar_prefetch = 0 : i64, scratch_operands = 0 : i64, tpu.core_type = #tpu.core_type<tc>, window_params = [{transform_indices = @transform_0, window_bounds = array<i64: 36, 256>}, {pipeline_mode = #tpu.pipeline_mode<synchronous>, transform_indices = @transform_1, window_bounds = array<i64: 32, 36>}, {pipeline_mode = #tpu.pipeline_mode<synchronous>, transform_indices = @transform_2, window_bounds = array<i64: 32, 1>}, {pipeline_mode = #tpu.pipeline_mode<synchronous>, transform_indices = @transform_3, window_bounds = array<i64: 1, 256>}, {pipeline_mode = #tpu.pipeline_mode<synchronous>, transform_indices = @transform_4, window_bounds = array<i64: 32, 32>}, {pipeline_mode = #tpu.pipeline_mode<synchronous>, transform_indices = @transform_5, window_bounds = array<i64: 1, 32>}, {transform_indices = @transform_6, window_bounds = array<i64: 1, 1, 32>}]} {
    %c0 = arith.constant 0 : index
    %c0_0 = arith.constant 0 : index
    %0 = vector.load %arg2[%c0, %c0_0] : memref<32x36xbf16, #tpu.memory_space<vmem>>, vector<32x36xbf16>
    %c0_1 = arith.constant 0 : index
    %c0_2 = arith.constant 0 : index
    %1 = vector.load %arg1[%c0_1, %c0_2] : memref<36x256xbf16, #tpu.memory_space<vmem>>, vector<36x256xbf16>
    %cst = arith.constant dense<0.000000e+00> : vector<32x256xf32>
    %2 = tpu.matmul %0, %1, %cst {dimension_numbers = #tpu.dot_dimension_numbers<[1], [0], [0], [1], [0, 0, 1, 1], [], []>} : vector<32x36xbf16>, vector<36x256xbf16>, vector<32x256xf32> -> vector<32x256xf32>
    %c0_3 = arith.constant 0 : index
    %c0_4 = arith.constant 0 : index
    %3 = vector.load %arg3[%c0_3, %c0_4] : memref<32x1xf32, #tpu.memory_space<vmem>>, vector<32x1xf32>
    %4 = vector.broadcast %3 : vector<32x1xf32> to vector<32x256xf32>
    %5 = arith.addf %2, %4 : vector<32x256xf32>
    %cst_5 = arith.constant 0.000000e+00 : f32
    %6 = vector.broadcast %cst_5 : f32 to vector<32x256xf32>
    %7 = arith.maximumf %5, %6 : vector<32x256xf32>
    %c0_6 = arith.constant 0 : index
    %c0_7 = arith.constant 0 : index
    %8 = vector.load %arg4[%c0_6, %c0_7] : memref<1x256xf32, #tpu.memory_space<vmem>>, vector<1x256xf32>
    %cst_8 = arith.constant dense<0.000000e+00> : vector<1x32xf32>
    %9 = tpu.matmul %8, %7, %cst_8 {dimension_numbers = #tpu.dot_dimension_numbers<[1], [1], [0], [0], [0, 0, 1, 0], [], []>} : vector<1x256xf32>, vector<32x256xf32>, vector<1x32xf32> -> vector<1x32xf32>
    %c0_9 = arith.constant 0 : index
    %c0_10 = arith.constant 0 : index
    %10 = vector.load %arg5[%c0_9, %c0_10] : memref<32x32xf32, #tpu.memory_space<vmem>>, vector<32x32xf32>
    %cst_11 = arith.constant dense<0.000000e+00> : vector<1x32xf32>
    %11 = tpu.matmul %9, %10, %cst_11 {dimension_numbers = #tpu.dot_dimension_numbers<[1], [0], [0], [1], [0, 0, 1, 1], [], []>} : vector<1x32xf32>, vector<32x32xf32>, vector<1x32xf32> -> vector<1x32xf32>
    %c0_12 = arith.constant 0 : index
    %c0_13 = arith.constant 0 : index
    %12 = vector.load %arg6[%c0_12, %c0_13] : memref<1x32xf32, #tpu.memory_space<vmem>>, vector<1x32xf32>
    %13 = arith.addf %11, %12 : vector<1x32xf32>
    %14 = vector.shape_cast %13 : vector<1x32xf32> to vector<1x1x32xf32>
    %c0_14 = arith.constant 0 : index
    %c0_15 = arith.constant 0 : index
    %c0_16 = arith.constant 0 : index
    %15 = vector.load %arg7[%c0_14, %c0_15, %c0_16] : memref<1x1x32xf32, #tpu.memory_space<vmem>>, vector<1x1x32xf32>
    tpu.vector_store %arg7[%c0_14, %c0_15, %c0_16], %14 {strides = array<i32>} : memref<1x1x32xf32, #tpu.memory_space<vmem>>, vector<1x1x32xf32>,
    return
  }
  func.func @transform_0(%arg0: i32) -> (i32, i32) {
    %c0_i32 = arith.constant 0 : i32
    %c0_i32_0 = arith.constant 0 : i32
    return %c0_i32, %arg0 : i32, i32
  }
  func.func @transform_1(%arg0: i32) -> (i32, i32) {
    %c0_i32 = arith.constant 0 : i32
    %c0_i32_0 = arith.constant 0 : i32
    %c0_i32_1 = arith.constant 0 : i32
    return %c0_i32, %c0_i32_0 : i32, i32
  }
  func.func @transform_2(%arg0: i32) -> (i32, i32) {
    %c0_i32 = arith.constant 0 : i32
    %c0_i32_0 = arith.constant 0 : i32
    %c0_i32_1 = arith.constant 0 : i32
    return %c0_i32, %c0_i32_0 : i32, i32
  }
  func.func @transform_3(%arg0: i32) -> (i32, i32) {
    %c0_i32 = arith.constant 0 : i32
    %c0_i32_0 = arith.constant 0 : i32
    %c0_i32_1 = arith.constant 0 : i32
    return %c0_i32, %c0_i32_0 : i32, i32
  }
  func.func @transform_4(%arg0: i32) -> (i32, i32) {
    %c0_i32 = arith.constant 0 : i32
    %c0_i32_0 = arith.constant 0 : i32
    %c0_i32_1 = arith.constant 0 : i32
    return %c0_i32, %c0_i32_0 : i32, i32
  }
  func.func @transform_5(%arg0: i32) -> (i32, i32) {
    %c0_i32 = arith.constant 0 : i32
    %c0_i32_0 = arith.constant 0 : i32
    %c0_i32_1 = arith.constant 0 : i32
    return %c0_i32, %c0_i32_0 : i32, i32
  }
  func.func @transform_6(%arg0: i32) -> (i32, i32, i32) {
    %c0_i32 = arith.constant 0 : i32
    %c0_i32_0 = arith.constant 0 : i32
    %c0_i32_1 = arith.constant 0 : i32
    return %arg0, %c0_i32, %c0_i32_0 : i32, i32, i32
  }
}

</mosaic_0001>

<bundles_post_ra>
// kernel: tpu_custom_call.1
= control target key start
LH: loop header
LB: loop body
LE: loop exit
PB: predicated region body
PF: predicated region fallthrough
CT: control target
= control target key end

     0   :  { %11 = vsyncpa [#allocation3], 0  ;;  %s1216_s0 = inlined_call_operand.hbm [shape: bf16[36,512], index: 0, kind: input, shape index: {}]   ;;  %s1217_s1 = inlined_call_operand.vmem [shape: bf16[32,36], index: 1, kind: input, shape index: {}]   ;;  %s1218_s2 = inlined_call_operand.vmem [shape: f32[32,1], index: 2, kind: input, shape index: {}]   ;;  %s1219_s3 = inlined_call_operand.hbm [shape: f32[1,256], index: 3, kind: input, shape index: {}]   ;;  %s1220_s4 = inlined_call_operand.vmem [shape: f32[32,32], index: 4, kind: input, shape index: {}]   ;;  %s1221_s5 = inlined_call_operand.vmem [shape: f32[1,32], index: 5, kind: input, shape index: {}]   ;;  %s1222_s6 = inlined_call_operand.hbm [shape: f32[2,1,32], index: 6, kind: output, shape index: {}]  }
   0x1   :  { %13 = vsyncpa [#allocation3 + $0x1], 0 }
   0x2   :  { %14 = vsyncpa [#allocation6], 0 }
   0x3   :  { %15 = vsyncpa [#allocation4], 0 }
   0x4   :  { %17 = vsyncpa [#allocation4 + $0x1], 0  ;;  %s986_s21 = smov 0   ;;  %s988_s22 = smov 0  }
   0x5   :  { %s990_s23 = smov 0   ;;  %s992_s24 = smov 0  }
   0x6 LB: > { %s1007_s25 = sadd.s32 4294967295, %s939_s24   ;;  %s679_s26 = sadd.s32 4294967294, %s939_s24   ;;  %s939_s24 = sphi %s992_s24, %s1249_s24   ;;  %s935_s23 = sphi %s990_s23, %s1248_s23   ;;  %s931_s22 = sphi %s988_s22, %s1247_s22   ;;  %s927_s21 = sphi %s986_s21, %s1246_s21  }
   0x7   : > { %s1011_s27 = sadd.s32 1, %s939_s24   ;;  %s30_s28 = sadd.s32 1, %s935_s23 }
   0x8   : > { %s27_s29 = ssub.s32 %s939_s24, %s1011_s27  ;;  %p37_p0 = scmp.ne.s32.totalorder %s935_s23, %s931_s22 }
   0x9   : > { %p28_p1 = scmp.eq.s32.totalorder %s27_s29, 0  ;;  %p38_p2 = scmp.eq.s32.totalorder %s939_s24, 0 }
   0xa   : > { %p43_p3 = scmp.ne.s32.totalorder %s931_s22, %s927_s21  ;;  %p1223_p4 = scmp.eq.s32.totalorder %s1007_s25, 0 }
   0xb   : > { %s1023_s30 = scalar_select %p28_p1, %s935_s23, %s30_s28  }
   0xc   : > { %p1025_p5 = por %p38_p2, %p37_p0  ;;  %p1031_p6 = por %p1223_p4, %p43_p3 }
   0xd   : > { %1228 = sst [smem:[#allocation11_spill]] %s1023_s30  ;;  %p172_p7 = scmp.eq.s32.totalorder %s1007_s25, 1 }
   0xe   : > { %s1230_s8 = scalar_select %p1031_p6, 1, 0 }
   0xf   : > { %p178_p8 = scmp.eq.s32.totalorder %s679_s26, 1  ;;  %p680_p9 = scmp.ge.s32.totalorder %s939_s24, 1 }
  0x10   : > { %p185_p10 = scmp.lt.s32.totalorder %s939_s24, 3  ;;  %p1038_p11 = por %p172_p7, %p37_p0 }
  0x11   : > { %p1042_p12 = por %p178_p8, %p43_p3  ;;  %s941_s12 = smov [#allocation5]  }
  0x12   : > { %s1231_s9 = scalar_select %p1038_p11, 1, 0 }
  0x13   : > { %s1232_s10 = scalar_select %p1042_p12, 1, 0 }
  0x14   : > { %p1046_p13 = pnand %p680_p9, %p185_p10  ;;  %s204_s13 = sshll.u32 %s941_s12, 4  ;;  %s205_s13 = int_to_ptr.vmem [resolvable:$true] %s204_s13 }
  0x15   : > { %p756_p4 = scmp.lt.s32.totalorder %s939_s24, 2  ;;  %p1234_p0 = scmp.eq.s32.totalorder %s1007_s25, 0 }
  0x16   : > { %s1233_s11 = scalar_select %p1046_p13, 1, 0 }
  0x17   : > { %p743_p2 = pneg %p1046_p13  ;;  %s221_s15 = sand.u32 1, %s935_s23  }
  0x18   : > { %p1063_p3 = pnand %p756_p4, %p1025_p5  ;;  %s733_s17 = smul.u32 40, %s221_s15 }
  0x19   : > { %p1056_p7 = pnand %p743_p2, %p1234_p0  ;;  %s811_s20 = scalar_lea.hbm %s1219_s3, 32 }
  0x1a   : > { %s1236_s16 = scalar_select %p1063_p3, 1, 0 }
  0x1b   : > { %p812_p8 = scmp.ne.s32.totalorder %s1219_s3, %s811_s20  ;;  %p813_p9 = pneg %p1056_p7 }
  0x1c   : > { %p818_p4 = scmp.lt.u32.totalorder %s811_s20, %s1219_s3 }
  0x1d   : > { %p814_p10 = pnand %p813_p9, %p812_p8 }
  0x1f   : > { %p815_p2 = pneg %p814_p10 }
  0x21   : > { %p820_p5 = pnand %p818_p4, %p815_p2 }
  0x23   : > { %823 = shalt.err (!%p820_p5)
}
  0x24   : > { %s824_s7 = scalar_lea.vmem %s205_s13, 32  ;;  %p832_p11 = scmp.lt.s32.totalorder %s205_s13, %s205_s13 }
  0x25   : > { %p825_p0 = scmp.ne.s32.totalorder %s205_s13, %s824_s7  ;;  %p833_p6 = scmp.lt.s32.totalorder %s824_s7, %s824_s7 }
  0x27   : > { %p827_p1 = pnand %p825_p0, %p813_p9  ;;  %p834_p13 = por %p833_p6, %p832_p11 }
  0x29   : > { %p828_p12 = pneg %p827_p1 }
  0x2b   : > { %p835_p3 = pnand %p834_p13, %p828_p12 }
  0x2d   : > { %838 = shalt.err (!%p835_p3)
}
  0x2e   : > { %746 = dma.hbm_to_vmem [thread:$0]  (!%p1056_p7), %s1219_s3, 32, %s205_s13, [#allocation6]  }
  0x2f   : > { %s702_s20 = sshll.u32 %s939_s24, 7  ;;  %s225_s26 = scalar_lea.vmem [#allocation2], %s733_s17 }
  0x30   : > { %s232_s28 = sshll.u32 %s225_s26, 4  ;;  %s1087_s30 = scalar_lea.hbm %s1216_s0, %s702_s20  ;;  %s1089_s28 = int_to_ptr.vmem [resolvable:$true] %s232_s28 }
  0x31   : > { %s1091_s14 = scalar_lea.sflag [#allocation3], %s221_s15  ;;  %s839_s7 = scalar_lea.hbm %s1087_s30, 640 }
  0x32   : > { %p840_p6 = scmp.ne.s32.totalorder %s1087_s30, %s839_s7  ;;  %p1237_p11 = scmp.ne.s32.totalorder %s1236_s16, 0 }
  0x33   : > { %s844_s18 = scalar_lea.hbm %s1216_s0, 1280  ;;  %p845_p7 = scmp.lt.u32.totalorder %s1087_s30, %s1216_s0 }
  0x34   : > { %p841_p12 = pneg %p1237_p11  ;;  %p846_p3 = scmp.lt.u32.totalorder %s844_s18, %s839_s7 }
  0x35   : > { %p848_p9 = scmp.lt.u32.totalorder %s839_s7, %s1087_s30 }
  0x36   : > { %p842_p13 = pnand %p841_p12, %p840_p6  ;;  %p847_p8 = por %p846_p3, %p845_p7 }
  0x38   : > { %p843_p1 = pneg %p842_p13  ;;  %p849_p10 = por %p848_p9, %p847_p8 }
  0x3a   : > { %p850_p2 = pnand %p849_p10, %p843_p1 }
  0x3c   : > { %853 = shalt.err (!%p850_p2)
}
  0x3d   : > { %s854_s15 = scalar_lea.vmem %s1089_s28, 640  ;;  %s942_s26 = smov [#allocation2]  }
  0x3e   : > { %p855_p4 = scmp.ne.s32.totalorder %s1089_s28, %s854_s15  ;;  %s859_s29 = sshll.u32 %s942_s26, 4  ;;  %s860_s29 = int_to_ptr.vmem [resolvable:$false] %s859_s29 }
  0x3f   : > { %s861_s12 = scalar_lea.vmem %s860_s29, 1280  ;;  %p862_p6 = scmp.lt.s32.totalorder %s1089_s28, %s860_s29 }
  0x40   : > { %p857_p5 = pnand %p855_p4, %p841_p12  ;;  %p863_p13 = scmp.lt.s32.totalorder %s861_s12, %s854_s15 }
  0x42   : > { %p858_p0 = pneg %p857_p5  ;;  %p864_p7 = por %p863_p13, %p862_p6 }
  0x44   : > { %p865_p3 = pnand %p864_p7, %p858_p0 }
  0x46   : > { %868 = shalt.err (!%p865_p3)
}
  0x47   : > { %s943_s7 = smov 256   ;;  %s944_s13 = smov 128  }
  0x48   : > { %s945_s17 = smov 8   ;;  %p1238_p12 = scmp.ne.s32.totalorder %s1233_s11, 0 }
  0x49   : > { %750 = dma.hbm_to_vmem [thread:$0]  (!%p1237_p11), %s1087_s30, 640, %s1089_s28, %s1091_s14, %s943_s7, %s944_s13, %s945_s17  }
  0x4a   : > { %244 = sbr.rel (%p1238_p12) target bundleno = 776 (0x308), region = 44  ;;  %s1122_s18 = sand.u32 (!%p1238_p12), 1, %s931_s22  }
  0x4b   : > { %s734_s19 = smul.u32 (!%p1238_p12), 40, %s1122_s18  ;;  %s247_s20 = scalar_lea.sflag (!%p1238_p12), [#allocation3], %s1122_s18 }
  0x4c   : > { %p1239_p1 = scmp.ne.s32.totalorder (!%p1238_p12), %s1230_s8, 0 }
  0x4d   : > { %s250_s15 = scalar_lea.vmem (!%p1238_p12), [#allocation2], %s734_s19 }
  0x51   : > { %914 = dma.done.wait (%p1239_p1), %s247_s20, 640  }
  0x52   : > { %916 = vsyncadd (%p1239_p1), %s247_s20, 4294966656  ;;  %p1240_p8 = scmp.eq.s32.totalorder %s1007_s25, 0 }
  0x54   : > { %918 = dma.done.wait (%p1240_p8), [#allocation6], 32   ;;  %p1241_p11 = pmov %p1240_p8 }
  0x55   : > { %v946_v0 = vmov 0   ;;  %v801_v1 = vld [vmem:[%s250_s15 + $0x4] ss:$8 sps:$4 sm:$0xff]   ;;  %v803_v2 = vld [vmem:[%s250_s15] ss:$8 sps:$4 sm:$0xff]   ;;  %vm359_vm0 = vcmask 1041408   ;;  %v429_v15 = vlaneseq }
  0x56   : > { %920 = vsyncadd (%p1241_p11), [#allocation6], 4294967264  ;;  %398 = vmatprep.mubr.bf16.mxu0 %v946_v0  ;;  %799 = vset.pattern.permute.xlu0 %v946_v0  ;;  %v804_v3 = vld [vmem:[%s250_s15 + $0x14] ss:$8 sps:$4 sm:$0xff]   ;;  %v292_v4 = vld [vmem:[%s250_s15 + $0x20] sm:$0x33] }
  0x57   : > { %800 = vset.pattern.permute.xlu1 %v946_v0  ;;  %366 = vmatprep.subr.bf16.mxu0 %v801_v1  ;;  %v806_v5 = vld [vmem:[%s250_s15 + $0x10] ss:$8 sps:$4 sm:$0xff]   ;;  %v694_v6 = vcombine.high %v292_v4, %v292_v4  ;;  %v693_v7 = vcombine.low %v292_v4, %v292_v4  ;;  %v294_v10 = vld [vmem:[%s1218_s2 + $0x8] sm:$0xff]  ;;  %vm352_vm1 = vcmask 293888   ;;  %v430_v16 = vshrl.u32 %v429_v15, 7  ;;  %s699_s29 = sshll.u32 %s1007_s25, 4 }
  0x58   : > { %367 = vmatpush1.bf16.msra.mxu0 %v803_v2  ;;  %v293_v8 = vld [vmem:[%s1218_s2] sm:$0xff]  ;;  %v295_v9 = vld [vmem:[%s1218_s2 + $0x10] sm:$0xff]  ;;  %v296_v11 = vld [vmem:[%s1218_s2 + $0x18] sm:$0xff]  ;;  %v947_v54 = vmov 0.0|0.0   ;;  %vm948_vm2 = vmmov 0   ;;  %v949_v61 = vmov 0.0   ;;  %s1172_s19 = scalar_lea.hbm %s1222_s6, %s699_s29 }
  0x59   : > { %368 = vmatprep.subr.bf16.mxu0 %v804_v3  ;;  %299 = vperm.xlu0 %799, %v293_v8   ;;  %v361_v12 = vsel %vm359_vm0, %v693_v7, 0  ;;  %v809_v13 = vld [vmem:[%s1217_s1] sm:$0xff]   ;;  %v810_v14 = vld [vmem:[%s1217_s1 + $0x8] sm:$0xff]   ;;  %v427_v17 = vld [vmem:[#allocation5] sm:$0x3]  ;;  %v431_v18 = vsub.s32 0, %v430_v16 }
  0x5a   : > { %309 = vperm.xlu1 %800, %v295_v9   ;;  %v435_v19 = vsub.s32 1, %v430_v16  ;;  %v509_v55 = vld [vmem:[%s1220_s4] sm:$0xff]  ;;  %v510_v56 = vld [vmem:[%s1220_s4 + $0x8] sm:$0xff]  ;;  %v511_v58 = vld [vmem:[%s1220_s4 + $0x10] sm:$0xff]  ;;  %vm514_vm3 = vcmask 261120   ;;  %s281_s12 = scalar_lea.vmem [#allocation7], %s1122_s18 }
  0x5b   : > { %v432_v20 = vrot.slane %v427_v17, %v431_v18  ;;  %v728_v57 = vpack.c.bf16 %v510_v56, %v509_v55  ;;  %v512_v59 = vld [vmem:[%s1220_s4 + $0x18] sm:$0xff]  ;;  %s603_s7 = sshll.u32 %s281_s12, 4  ;;  %vm588_vm4 = vcmask 253952   ;;  %s591_s20 = scalar_lea.sflag [#allocation4], %s1122_s18  ;;  %s1174_s7 = int_to_ptr.vmem [resolvable:$true] %s603_s7 }
  0x5c   : > { %369 = vmatpush1.bf16.msra.mxu0 %v806_v5  ;;  %v436_v21 = vrot.slane %v427_v17, %v435_v19  ;;  %v731_v60 = vpack.c.bf16 %v512_v59, %v511_v58  ;;  %s869_s15 = scalar_lea.vmem %s1174_s7, 16  ;;  %p1242_p10 = scmp.ne.s32.totalorder %s1231_s9, 0 }
  0x5d   : > { %695 = vmatprep.subr.msk.bf16.mxu0 %vm359_vm0, %v694_v6  ;;  %304 = vperm.xlu0 %799, %v294_v10   ;;  %p870_p9 = scmp.ne.s32.totalorder %s1174_s7, %s869_s15  ;;  %s950_s25 = smov [#allocation7]  }
  0x5e   : > { %314 = vperm.xlu1 %800, %v296_v11   ;;  %503 = vmatprep.mubr.f32.mxu1 %v436_v21  ;;  %s873_s30 = sshll.u32 %s950_s25, 4  ;;  %s874_s30 = int_to_ptr.vmem [resolvable:$false] %s873_s30 }
  0x5f   : > { %p871_p2 = pnand %p870_p9, %p1242_p10  ;;  %s875_s8 = scalar_lea.vmem %s874_s30, 32 }
  0x60   : > { %371 = vmatpush1.bf16.msra.mxu0 %v361_v12  ;;  %p876_p5 = scmp.lt.s32.totalorder %s1174_s7, %s874_s30  ;;  %p877_p0 = scmp.lt.s32.totalorder %s875_s8, %s869_s15 }
  0x61   : > { %p872_p4 = pneg %p871_p2 }
  0x62   : > { %p878_p6 = por %p877_p0, %p876_p5 }
  0x63   : > { %696 = vmatmul.mubr.msk.bf16.vlgmr.msra.gmra.mrb[0].mxu0 %vm352_vm1, %v809_v13 }
  0x64   : > { %408 = vmatprep.mubr.bf16.mxu0 %v946_v0  ;;  %v513_v0 = vld [vmem:[%s1221_s5] sm:$0x1]  ;;  %p879_p13 = pnand %p878_p6, %p872_p4 }
  0x6b   : > { %697 = vmatmul.mubr.msk.bf16.gmra.mrb[4].mxu0 %vm352_vm1, %v810_v14 }
  0xd8   : > { %v300_v22 = vpop.permute.xlu0 %299 }
  0xd9   : > { %v310_v31 = vpop.permute.xlu1 %309 }
  0xdc   : > { %v305_v26 = vpop.permute.xlu0 %304 }
  0xdd   : > { %v315_v42 = vpop.permute.xlu1 %314 }
 0x136   : > { %v400_v23 = vpop.f32.mrb[0].mxu0 }
 0x137   : > { %v401_v24 = vadd.f32 %v400_v23, %v300_v22  ;;  %v402_v25 = vpop.f32.mrb[1].mxu0 }
 0x138   : > { %v403_v27 = vadd.f32 %v402_v25, %v300_v22  ;;  %v404_v28 = vpop.f32.mrb[2].mxu0 }
 0x139   : > { %v405_v29 = vadd.f32 %v404_v28, %v305_v26  ;;  %v406_v30 = vpop.f32.mrb[3].mxu0  ;;  %v419_v33 = vmax.f32 %v401_v24, 0.0 }
 0x13a   : > { %v407_v32 = vadd.f32 %v406_v30, %v305_v26  ;;  %v420_v35 = vmax.f32 %v403_v27, 0.0 }
 0x13b   : > { %v421_v34 = vmax.f32 %v405_v29, 0.0 }
 0x13c   : > { %v422_v36 = vmax.f32 %v407_v32, 0.0 }
 0x13d   : > { %v721_v37 = vpack.c.bf16 %v421_v34, %v419_v33 }
 0x13e   : > { %v410_v38 = vpop.f32.mrb[4].mxu0  ;;  %v719_v39 = vpack.c.bf16 %v422_v36, %v420_v35 }
 0x13f   : > { %v411_v40 = vadd.f32 %v410_v38, %v310_v31  ;;  %v412_v41 = vpop.f32.mrb[5].mxu0 }
 0x140   : > { %v413_v43 = vadd.f32 %v412_v41, %v310_v31  ;;  %v414_v44 = vpop.f32.mrb[6].mxu0  ;;  %720 = vmatprep.subr.bf16.mxu1 %v719_v39 }
 0x141   : > { %v415_v45 = vadd.f32 %v414_v44, %v315_v42  ;;  %v416_v46 = vpop.f32.mrb[7].mxu0  ;;  %722 = vmatpush1.bf16.xpose.msra.mxu1 %v721_v37  ;;  %v423_v48 = vmax.f32 %v411_v40, 0.0 }
 0x142   : > { %v417_v47 = vadd.f32 %v416_v46, %v315_v42  ;;  %v424_v50 = vmax.f32 %v413_v43, 0.0 }
 0x143   : > { %v425_v49 = vmax.f32 %v415_v45, 0.0 }
 0x144   : > { %v426_v51 = vmax.f32 %v417_v47, 0.0 }
 0x145   : > { %v725_v52 = vpack.c.bf16 %v425_v49, %v423_v48 }
 0x146   : > { %v723_v53 = vpack.c.bf16 %v426_v51, %v424_v50 }
 0x148   : > { %724 = vmatprep.subr.bf16.mxu1 %v723_v53 }
 0x149   : > { %726 = vmatpush1.bf16.xpose.msra.mxu1 %v725_v52 }
 0x14a   : > { %727 = vmatprep.subr.bf16.mxu1 %v947_v54 }
 0x150   : > { %504 = vmatmul.mubr.f32.vlgmr.msra.gmra.mrb[0].mxu1 %v432_v20 }
 0x151   : > { %729 = vmatpush3.bf16.msra.mxu1 %v728_v57  ;;  %716 = vmatprep.mubr.msk.f32.mxu1 %vm948_vm2, %v949_v61 }
 0x152   : > { %730 = vmatprep.subr.bf16.mxu1 %v947_v54 }
 0x155   : > { %732 = vmatpush3.bf16.msra.mxu1 %v731_v60 }
 0x223   : > { %v505_v62 = vpop.f32.mrb[0].mxu1 }
 0x224   : > { %v507_v63 = vpop.f32.mrb[1].mxu1  ;;  %717 = vmatmul.mubr.msk.f32.vlgmr.msra.gmra.mrb[2].mxu1 %vm514_vm3, %v505_v62 }
 0x2f7   : > { %v584_v1 = vpop.f32.mrb[2].mxu1 }
 0x2f8   : > { %v585_v2 = vadd.f32 %v584_v1, %v513_v0  ;;  %v718_v3 = vpop.f32.mrb[3].mxu1 }
 0x2fa   : > { %589 = vst.msk [vmem:[%s281_s12] sm:$0x1] %vm588_vm4, %v585_v2 }
 0x2fb   : > { %882 = shalt.err (!%p879_p13)
}
 0x2fc   : > { %s883_s18 = scalar_lea.hbm %s1172_s19, 16  ;;  %s887_s28 = scalar_lea.hbm %s1222_s6, 32 }
 0x2fd   : > { %p884_p7 = scmp.ne.s32.totalorder %s1172_s19, %s883_s18  ;;  %p888_p1 = scmp.lt.u32.totalorder %s1172_s19, %s1222_s6 }
 0x2fe   : > { %p889_p8 = scmp.lt.u32.totalorder %s887_s28, %s883_s18  ;;  %p891_p9 = scmp.lt.u32.totalorder %s883_s18, %s1172_s19 }
 0x2ff   : > { %p885_p3 = pnand %p884_p7, %p1242_p10 }
 0x300   : > { %p890_p11 = por %p889_p8, %p888_p1 }
 0x301   : > { %p886_p12 = pneg %p885_p3 }
 0x302   : > { %p892_p2 = por %p891_p9, %p890_p11 }
 0x304   : > { %p893_p4 = pnand %p892_p2, %p886_p12 }
 0x306   : > { %896 = shalt.err (!%p893_p4)
}
 0x307   : > { %741 = dma.vmem_to_hbm [thread:$0]  (%p1242_p10), %s1174_s7, 16, %s1172_s19, %s591_s20  }
 0x308 PF: > { %s615_s29 = sand.u32 1, %s927_s21   ;;  %p1243_p5 = scmp.ne.s32.totalorder %s1232_s10, 0 }
 0x309   : > { %p1244_p0 = scmp.ge.s32.totalorder %s939_s24, 2  ;;  %s616_s12 = scalar_lea.sflag [#allocation4], %s615_s29 }
 0x30b   : > { %p752_p6 = pnand %p1244_p0, %p1243_p5 }
 0x30d   : > { %922 = dma.done.wait (!%p752_p6), %s616_s12, 16  }
 0x30e   : > { %924 = vsyncadd (!%p752_p6), %s616_s12, 4294967280  ;;  %s1245_s13 = sld [smem:[#allocation11_spill]]  ;;  %p20_p13 = scmp.ge.s32.totalorder %s1011_s27, 4  }
 0x30f   : > { %s1246_s21 = smov %s931_s22  ;;  %s1247_s22 = smov %s935_s23 }
 0x310   : > { %s1249_s24 = smov %s1011_s27  ;;  %22 = sbr.rel (!%p20_p13) target bundleno = 6 (0x6), region = 93 }
 0x314   : > { %s1248_s23 = smov %s1245_s13 }
 0x317   :  { %620 = vsyncpa [#allocation3], 1 }
 0x318   :  { %622 = vsyncpa [#allocation3 + $0x1], 1 }
 0x319   :  { %623 = vsyncpa [#allocation6], 1 }
 0x31a   :  { %624 = vsyncpa [#allocation4], 1 }
 0x31b   :  { %626 = vsyncpa [#allocation4 + $0x1], 1 }

</bundles_post_ra>
